<compile_context>
chip_gen: v7x
topology: tpu7x:2x2x1
jax: 0.10.0
libtpu: 0.0.40
codegen_flags: <defaults>
</compile_context>

<pallas_src>
import jax
import jax.numpy as jnp
from jax.experimental import pallas as pl
from jax.experimental.pallas import tpu as pltpu

_LANES = 128
_SUBLANES = 8


def _round_up(n, m):
    return ((n + m - 1) // m) * m


def _fnetwork_kernel(x_ref, w1_ref, w2_ref, b_ref, o_ref):
    # x_ref : (rows, D_in)       VMEM  f32  (cast to weight dtype in-kernel)
    # w1_ref: (D_in, H)          VMEM  f32 / bf16
    # w2_ref: (H, D_out_pad)     VMEM  f32 / bf16  (padded cols are zero)
    # b_ref : (2, bias_cols)     VMEM  f32   row 0 = b1, row 1 = b2 (zero padded)
    # o_ref : (rows, D_out_pad)  VMEM  f32   lane-dense store
    hidden = w1_ref.shape[1]
    out_pad = w2_ref.shape[1]
    x = x_ref[...].astype(w1_ref.dtype)          # in-kernel cast (free on f32 path)
    h = jnp.dot(x, w1_ref[...], preferred_element_type=jnp.float32)
    h = h + b_ref[0:1, :hidden]
    h = jnp.maximum(h, 0.0).astype(w2_ref.dtype)
    y = jnp.dot(h, w2_ref[...], preferred_element_type=jnp.float32)
    y = y + b_ref[1:2, :out_pad]
    o_ref[...] = y.astype(o_ref.dtype)


def make_fnetwork(w1, b1, w2, b2, *, use_bf16=True, block_rows=256):
    """Prepare FNetwork params ONCE and return a forward function.

    w1: (input_dim, hidden_dim)   b1: (hidden_dim,)
    w2: (hidden_dim, output_dim)  b2: (output_dim,)

    Returned function maps
        (input_dim,)    -> (output_dim,)        (the PyTorch module's contract)
        (M, input_dim)  -> (M, output_dim)      (batched; amortizes launch cost)

    use_bf16=True stores the weights in bf16 (f32 MXU accumulation) — the
    weight DMA is the dominant byte traffic of this call at small M.
    """
    assert block_rows % _SUBLANES == 0, "block_rows must be a multiple of 8"
    input_dim, hidden_dim = w1.shape
    output_dim = w2.shape[1]
    out_pad = _round_up(output_dim, _LANES)
    bias_cols = max(hidden_dim, out_pad)
    w_dtype = jnp.bfloat16 if use_bf16 else jnp.float32
    w_bytes = jnp.dtype(w_dtype).itemsize

    # ---- one-time layout / cast work (hoisted out of the per-call path) ----
    w1_p = jnp.asarray(w1, w_dtype)
    w2_p = (
        jnp.zeros((hidden_dim, out_pad), w_dtype)
        .at[:, :output_dim]
        .set(jnp.asarray(w2, w_dtype))
    )
    bias_p = (
        jnp.zeros((2, bias_cols), jnp.float32)
        .at[0, :hidden_dim].set(jnp.asarray(b1, jnp.float32))
        .at[1, :output_dim].set(jnp.asarray(b2, jnp.float32))
    )

    def _cost(m_pad):
        flops = 2 * m_pad * (input_dim * hidden_dim + hidden_dim * out_pad)
        bytes_accessed = (
            m_pad * input_dim * 4               # x (f32 at the boundary)
            + input_dim * hidden_dim * w_bytes  # w1
            + hidden_dim * out_pad * w_bytes    # w2 (padded)
            + 2 * bias_cols * 4                 # packed biases (f32)
            + m_pad * out_pad * 4               # output (f32, lane-dense)
        )
        return pl.CostEstimate(flops=flops, transcendentals=0,
                               bytes_accessed=bytes_accessed)

    @jax.jit
    def _run(x_pad):
        """(m_pad, input_dim) f32 -> (m_pad, output_dim) f32; m_pad is a bucket."""
        m_pad = x_pad.shape[0]
        if m_pad <= block_rows:
            # Gridless call: whole operands as single VMEM blocks, no pipelining
            # overhead.  Capped at block_rows rows so intermediates stay small
            # (no vreg-spill blow-up, trivially inside every chip's VMEM).
            out = pl.pallas_call(
                _fnetwork_kernel,
                out_shape=jax.ShapeDtypeStruct((m_pad, out_pad), jnp.float32),
                in_specs=[pl.BlockSpec(memory_space=pltpu.MemorySpace.VMEM)] * 4,
                out_specs=pl.BlockSpec(memory_space=pltpu.MemorySpace.VMEM),
                cost_estimate=_cost(m_pad),
            )(x_pad, w1_p, w2_p, bias_p)
        else:
            # Row-tiled grid: x / out stream through per-row-tile DMAs (double
            # buffered), weights + biases stay VMEM-resident (constant
            # index_map), and the parallel row axis lets v7x's two TensorCores
            # split the work.  Constant VMEM footprint regardless of M.
            grid = (m_pad // block_rows,)
            out = pl.pallas_call(
                _fnetwork_kernel,
                out_shape=jax.ShapeDtypeStruct((m_pad, out_pad), jnp.float32),
                grid_spec=pltpu.PrefetchScalarGridSpec(
                    num_scalar_prefetch=0,
                    grid=grid,
                    in_specs=[
                        pl.BlockSpec((block_rows, input_dim), lambda i: (i, 0)),
                        pl.BlockSpec((input_dim, hidden_dim), lambda i: (0, 0)),
                        pl.BlockSpec((hidden_dim, out_pad), lambda i: (0, 0)),
                        pl.BlockSpec((2, bias_cols), lambda i: (0, 0)),
                    ],
                    out_specs=pl.BlockSpec((block_rows, out_pad),
                                           lambda i: (i, 0)),
                ),
                compiler_params=pltpu.CompilerParams(
                    dimension_semantics=("parallel",)),
                cost_estimate=_cost(m_pad),
            )(x_pad, w1_p, w2_p, bias_p)
        # Column slice (drop the zero-padded lanes) fused inside the jitted call.
        return out[:, :output_dim]

    def _bucket(m):
        if m <= block_rows:
            return min(block_rows, max(_SUBLANES, pl.next_power_of_2(m)))
        return _round_up(m, block_rows)

    def forward(x):
        """(input_dim,) -> (output_dim,)  or  (M, input_dim) -> (M, output_dim)."""
        squeeze = x.ndim == 1
        x2d = x.reshape(1, input_dim) if squeeze else x
        m = x2d.shape[0]
        m_pad = _bucket(m)
        if m_pad != m:
            x2d = jnp.pad(x2d, ((0, m_pad - m), (0, 0)))
        y = _run(x2d)
        if m_pad != m:
            y = y[:m]
        return y.reshape(output_dim) if squeeze else y

    return forward


def _init_params(key, input_dim, hidden_dim, output_dim):
    """Deterministic init mimicking nn.Linear's uniform(-1/sqrt(fan_in), +...)."""
    k1, k2, k3, k4 = jax.random.split(key, 4)
    lim1 = 1.0 / jnp.sqrt(jnp.float32(input_dim))
    lim2 = 1.0 / jnp.sqrt(jnp.float32(hidden_dim))
    w1 = jax.random.uniform(k1, (input_dim, hidden_dim), jnp.float32, -lim1, lim1)
    b1 = jax.random.uniform(k2, (hidden_dim,), jnp.float32, -lim1, lim1)
    w2 = jax.random.uniform(k3, (hidden_dim, output_dim), jnp.float32, -lim2, lim2)
    b2 = jax.random.uniform(k4, (output_dim,), jnp.float32, -lim2, lim2)
    return w1, b1, w2, b2


if __name__ == "__main__":
    key = jax.random.PRNGKey(0)
    k_param, k_vec, k_b8, k_b5, k_big = jax.random.split(key, 5)

    input_dim = 16     # B: length of the histogram vector
    hidden_dim = 128   # module default hidden width (lane-aligned)
    output_dim = 8     # K: number of estimated feature values

    w1, b1, w2, b2 = _init_params(k_param, input_dim, hidden_dim, output_dim)

    def ref_fn(x):
        return jnp.maximum(x @ w1 + b1, 0.0) @ w2 + b2

    # --- f32 path: exact semantics of the PyTorch module (1-D in, 1-D out) ---
    fwd_f32 = make_fnetwork(w1, b1, w2, b2, use_bf16=False)
    h_vec = jax.random.uniform(k_vec, (input_dim,), jnp.float32)
    f_hat = jax.block_until_ready(fwd_f32(h_vec))
    assert f_hat.shape == (output_dim,)
    assert jnp.allclose(f_hat, ref_fn(h_vec), atol=1e-5, rtol=1e-5)

    # --- batched gridless path (bucket == batch: no pad / no extra ops) ---
    h8 = jax.random.uniform(k_b8, (8, input_dim), jnp.float32)
    f8 = jax.block_until_ready(fwd_f32(h8))
    assert f8.shape == (8, output_dim)
    assert jnp.allclose(f8, ref_fn(h8), atol=1e-5, rtol=1e-5)

    # --- non-bucket batch: exercises pad-to-bucket + row slice, reuses the
    #     m=8 compiled variant (bounded recompiles) ---
    h5 = jax.random.uniform(k_b5, (5, input_dim), jnp.float32)
    f5 = jax.block_until_ready(fwd_f32(h5))
    assert f5.shape == (5, output_dim)
    assert jnp.allclose(f5, ref_fn(h5), atol=1e-5, rtol=1e-5)

    # --- row-grid path (small block_rows so the grid is exercised at small
    #     shapes): f32 for an exact check of the tiled code path ---
    fwd_f32_tiled = make_fnetwork(w1, b1, w2, b2, use_bf16=False, block_rows=64)
    h128 = jax.random.uniform(k_big, (128, input_dim), jnp.float32)
    f128 = jax.block_until_ready(fwd_f32_tiled(h128))
    assert f128.shape == (128, output_dim)
    assert jnp.allclose(f128, ref_fn(h128), atol=1e-5, rtol=1e-5)

    # --- default path (bf16 weight storage, f32 accumulation), row grid ---
    fwd_bf16 = make_fnetwork(w1, b1, w2, b2, block_rows=64)
    fb = jax.block_until_ready(fwd_bf16(h128))
    assert fb.shape == (128, output_dim)
    assert jnp.allclose(fb, ref_fn(h128), atol=5e-2, rtol=5e-2)

    print("KERNEL_OK")
</pallas_src>

<mosaic_0001>
module attributes {stable_mosaic.version = 11 : i64} {
  func.func @_fnetwork_kernel(%arg0: memref<8x16xf32, #tpu.memory_space<vmem>>, %arg1: memref<16x128xf32, #tpu.memory_space<vmem>>, %arg2: memref<128x128xf32, #tpu.memory_space<vmem>>, %arg3: memref<2x128xf32, #tpu.memory_space<vmem>>, %arg4: memref<8x128xf32, #tpu.memory_space<vmem>>) attributes {dimension_semantics = [], scalar_prefetch = 0 : i64, scratch_operands = 0 : i64, tpu.core_type = #tpu.core_type<tc>} {
    %c0 = arith.constant 0 : index
    %c0_0 = arith.constant 0 : index
    %0 = vector.load %arg0[%c0, %c0_0] : memref<8x16xf32, #tpu.memory_space<vmem>>, vector<8x16xf32>
    %c0_1 = arith.constant 0 : index
    %c0_2 = arith.constant 0 : index
    %1 = vector.load %arg1[%c0_1, %c0_2] : memref<16x128xf32, #tpu.memory_space<vmem>>, vector<16x128xf32>
    %cst = arith.constant dense<0.000000e+00> : vector<8x128xf32>
    %2 = tpu.matmul %0, %1, %cst {dimension_numbers = #tpu.dot_dimension_numbers<[1], [0], [0], [1], [0, 0, 1, 1], [], []>} : vector<8x16xf32>, vector<16x128xf32>, vector<8x128xf32> -> vector<8x128xf32>
    %c0_3 = arith.constant 0 : index
    %c0_4 = arith.constant 0 : index
    %3 = vector.load %arg3[%c0_3, %c0_4] : memref<2x128xf32, #tpu.memory_space<vmem>>, vector<1x128xf32>
    %4 = vector.broadcast %3 : vector<1x128xf32> to vector<8x128xf32>
    %5 = arith.addf %2, %4 : vector<8x128xf32>
    %cst_5 = arith.constant 0.000000e+00 : f32
    %6 = vector.broadcast %cst_5 : f32 to vector<8x128xf32>
    %7 = arith.maximumf %5, %6 : vector<8x128xf32>
    %c0_6 = arith.constant 0 : index
    %c0_7 = arith.constant 0 : index
    %8 = vector.load %arg2[%c0_6, %c0_7] : memref<128x128xf32, #tpu.memory_space<vmem>>, vector<128x128xf32>
    %cst_8 = arith.constant dense<0.000000e+00> : vector<8x128xf32>
    %9 = tpu.matmul %7, %8, %cst_8 {dimension_numbers = #tpu.dot_dimension_numbers<[1], [0], [0], [1], [0, 0, 1, 1], [], []>} : vector<8x128xf32>, vector<128x128xf32>, vector<8x128xf32> -> vector<8x128xf32>
    %c1 = arith.constant 1 : index
    %c0_9 = arith.constant 0 : index
    %10 = vector.load %arg3[%c1, %c0_9] : memref<2x128xf32, #tpu.memory_space<vmem>>, vector<1x128xf32>
    %11 = vector.broadcast %10 : vector<1x128xf32> to vector<8x128xf32>
    %12 = arith.addf %9, %11 : vector<8x128xf32>
    %c0_10 = arith.constant 0 : index
    %c0_11 = arith.constant 0 : index
    %13 = vector.load %arg4[%c0_10, %c0_11] : memref<8x128xf32, #tpu.memory_space<vmem>>, vector<8x128xf32>
    tpu.vector_store %arg4[%c0_10, %c0_11], %12 {strides = array<i32>} : memref<8x128xf32, #tpu.memory_space<vmem>>, vector<8x128xf32>,
    return
  }
}

</mosaic_0001>

<bundles_post_ra>
// kernel: _run.1
= control target key start
LH: loop header
LB: loop body
LE: loop exit
PB: predicated region body
PF: predicated region fallthrough
CT: control target
= control target key end

     0   :  { %9 = vsyncpa [#allocation3], 0  ;;  %s537_s0 = inlined_call_operand.hbm [shape: f32[8,16], index: 0, kind: input, shape index: {}]   ;;  %s538_s1 = inlined_call_operand.hbm [shape: f32[16,128], index: 1, kind: input, shape index: {}]   ;;  %s539_s2 = inlined_call_operand.hbm [shape: f32[128,128], index: 2, kind: input, shape index: {}]   ;;  %s540_s3 = inlined_call_operand.vmem [shape: f32[2,128], index: 3, kind: input, shape index: {}]   ;;  %s541_s4 = inlined_call_operand.hbm [shape: f32[8,128], index: 4, kind: output, shape index: {}]  }
   0x1   :  { %10 = vsyncpa [#allocation6], 0 }
   0x2   :  { %11 = vsyncpa [#allocation4], 0  ;;  %s443_s15 = smov [#allocation5]   ;;  %s349_s19 = scalar_lea.hbm %s538_s1, 256 }
   0x3   :  { %s27_s16 = sshll.u32 %s443_s15, 4  ;;  %p350_p0 = scmp.ne.s32.totalorder %s538_s1, %s349_s19  ;;  %s28_s16 = int_to_ptr.vmem [resolvable:$true] %s27_s16 }
   0x4   :  { %p353_p1 = scmp.lt.u32.totalorder %s349_s19, %s538_s1 }
   0x6   :  { %p355_p2 = pnand %p353_p1, %p350_p0 }
   0x8   :  { %358 = shalt.err (!%p355_p2)
}
   0x9   :  { %s359_s24 = scalar_lea.vmem %s28_s16, 256  ;;  %p364_p4 = scmp.lt.s32.totalorder %s28_s16, %s28_s16 }
   0xa   :  { %p360_p3 = scmp.ne.s32.totalorder %s28_s16, %s359_s24  ;;  %p365_p5 = scmp.lt.s32.totalorder %s359_s24, %s359_s24 }
   0xc   :  { %p366_p6 = por %p365_p5, %p364_p4 }
   0xe   :  { %p367_p7 = pnand %p366_p6, %p360_p3 }
  0x10   :  { %370 = shalt.err (!%p367_p7)
}
  0x11   :  { %s444_s25 = smov 128   ;;  %s445_s26 = smov 8  }
  0x12   :  { %33 = dma.hbm_to_vmem [thread:$0]  %s538_s1, 256, %s28_s16, [#allocation6], %s444_s25, %s444_s25, %s445_s26  }
  0x13   :  { %s446_s29 = smov [#allocation2]   ;;  %s447_s5 = smov [#allocation7]  }
  0x14   :  { %s18_s30 = sshll.u32 %s446_s29, 4  ;;  %s39_s6 = sshll.u32 %s447_s5, 4  ;;  %s19_s30 = int_to_ptr.vmem [resolvable:$true] %s18_s30  ;;  %s40_s6 = int_to_ptr.vmem [resolvable:$true] %s39_s6 }
  0x15   :  { %s371_s9 = scalar_lea.hbm %s537_s0, 128 }
  0x16   :  { %p372_p8 = scmp.ne.s32.totalorder %s537_s0, %s371_s9  ;;  %p375_p9 = scmp.lt.u32.totalorder %s371_s9, %s537_s0 }
  0x18   :  { %p377_p10 = pnand %p375_p9, %p372_p8 }
  0x1a   :  { %380 = shalt.err (!%p377_p10)
}
  0x1b   :  { %s381_s1 = scalar_lea.vmem %s19_s30, 128  ;;  %p386_p12 = scmp.lt.s32.totalorder %s19_s30, %s19_s30 }
  0x1c   :  { %p382_p11 = scmp.ne.s32.totalorder %s19_s30, %s381_s1  ;;  %p387_p13 = scmp.lt.s32.totalorder %s381_s1, %s381_s1 }
  0x1e   :  { %p388_p0 = por %p387_p13, %p386_p12 }
  0x20   :  { %p389_p1 = pnand %p388_p0, %p382_p11 }
  0x22   :  { %392 = shalt.err (!%p389_p1)
}
  0x23   :  { %21 = dma.hbm_to_vmem [thread:$0]  %s537_s0, 128, %s19_s30, [#allocation3]  }
  0x24   :  { %s393_s18 = scalar_lea.hbm %s539_s2, 2048 }
  0x25   :  { %p394_p2 = scmp.ne.s32.totalorder %s539_s2, %s393_s18  ;;  %p397_p3 = scmp.lt.u32.totalorder %s393_s18, %s539_s2 }
  0x27   :  { %p399_p4 = pnand %p397_p3, %p394_p2 }
  0x29   :  { %402 = shalt.err (!%p399_p4)
}
  0x2a   :  { %s403_s23 = scalar_lea.vmem %s40_s6, 2048  ;;  %p408_p6 = scmp.lt.s32.totalorder %s40_s6, %s40_s6 }
  0x2b   :  { %p404_p5 = scmp.ne.s32.totalorder %s40_s6, %s403_s23  ;;  %p409_p7 = scmp.lt.s32.totalorder %s403_s23, %s403_s23 }
  0x2d   :  { %p410_p8 = por %p409_p7, %p408_p6 }
  0x2f   :  { %p411_p9 = pnand %p410_p8, %p404_p5 }
  0x31   :  { %414 = shalt.err (!%p411_p9)
}
  0x32   :  { %45 = dma.hbm_to_vmem [thread:$0]  %s539_s2, 2048, %s40_s6, [#allocation6], %s444_s25, %s444_s25, %s445_s26  }
  0x33   :  { %437 = dma.done.wait [#allocation3], 128  }
  0x34   :  { %438 = vsyncadd [#allocation3], 4294967168 }
  0x35   :  { %439 = dma.done.wait [#allocation6], 2304  }
  0x36   :  { %440 = vsyncadd [#allocation6], 4294964992  ;;  %v448_v0 = vmov 0.0|0.0   ;;  %vm449_vm0 = vmmov 0   ;;  %v450_v1 = vmov 0.0   ;;  %v58_v2 = vld [vmem:[#allocation5] sm:$0xff] }
  0x37   :  { %313 = vmatprep.subr.bf16.mxu0 %v448_v0  ;;  %275 = vmatprep.mubr.msk.f32.mxu0 %vm449_vm0, %v450_v1  ;;  %v59_v3 = vld [vmem:[#allocation5 + $0x8] sm:$0xff]  ;;  %v140_v5 = vld [vmem:[#allocation7] sm:$0xff]  ;;  %v141_v6 = vld [vmem:[#allocation7 + $0x8] sm:$0xff]  ;;  %vm65_vm1 = vcmask 130048   ;;  %s451_s28 = smov [#allocation8]  }
  0x38   :  { %316 = vmatprep.subr.bf16.mxu1 %v448_v0  ;;  %310 = vmatprep.mubr.msk.f32.mxu1 %vm449_vm0, %v450_v1  ;;  %v314_v4 = vpack.c.bf16 %v59_v3, %v58_v2  ;;  %v142_v7 = vld [vmem:[#allocation7 + $0x10] sm:$0xff]  ;;  %v317_v8 = vpack.c.bf16 %v141_v6, %v140_v5  ;;  %v143_v9 = vld [vmem:[#allocation7 + $0x18] sm:$0xff]  ;;  %v57_v10 = vld [vmem:[#allocation2] sm:$0xff]  ;;  %s238_s29 = sshll.u32 %s451_s28, 4  ;;  %s239_s29 = int_to_ptr.vmem [resolvable:$true] %s238_s29 }
  0x39   :  { %v320_v11 = vpack.c.bf16 %v143_v9, %v142_v7  ;;  %v144_v12 = vld [vmem:[#allocation7 + $0x20] sm:$0xff]  ;;  %v145_v13 = vld [vmem:[#allocation7 + $0x28] sm:$0xff]  ;;  %v146_v15 = vld [vmem:[#allocation7 + $0x30] sm:$0xff]  ;;  %s415_s30 = scalar_lea.vmem %s239_s29, 128  ;;  %p420_p11 = scmp.lt.s32.totalorder %s239_s29, %s239_s29 }
  0x3a   :  { %315 = vmatpush3.bf16.msra.mxu0 %v314_v4  ;;  %318 = vmatpush3.bf16.msra.mxu1 %v317_v8  ;;  %v323_v14 = vpack.c.bf16 %v145_v13, %v144_v12  ;;  %v147_v16 = vld [vmem:[#allocation7 + $0x38] sm:$0xff]  ;;  %v148_v18 = vld [vmem:[#allocation7 + $0x40] sm:$0xff]  ;;  %v149_v19 = vld [vmem:[#allocation7 + $0x48] sm:$0xff]  ;;  %p416_p10 = scmp.ne.s32.totalorder %s239_s29, %s415_s30  ;;  %p421_p12 = scmp.lt.s32.totalorder %s415_s30, %s415_s30 }
  0x3b   :  { %319 = vmatprep.subr.bf16.mxu1 %v448_v0  ;;  %v326_v17 = vpack.c.bf16 %v147_v16, %v146_v15  ;;  %v329_v20 = vpack.c.bf16 %v149_v19, %v148_v18  ;;  %v150_v21 = vld [vmem:[#allocation7 + $0x50] sm:$0xff]  ;;  %v151_v22 = vld [vmem:[#allocation7 + $0x58] sm:$0xff]  ;;  %v152_v24 = vld [vmem:[#allocation7 + $0x60] sm:$0xff] }
  0x3c   :  { %v332_v23 = vpack.c.bf16 %v151_v22, %v150_v21  ;;  %v153_v25 = vld [vmem:[#allocation7 + $0x68] sm:$0xff]  ;;  %v154_v27 = vld [vmem:[#allocation7 + $0x70] sm:$0xff]  ;;  %v155_v28 = vld [vmem:[#allocation7 + $0x78] sm:$0xff]  ;;  %p422_p13 = por %p421_p12, %p420_p11 }
  0x3d   :  { %276 = vmatmul.mubr.msk.f32.vlgmr.msra.gmra.mrb[0].mxu0 %vm65_vm1, %v57_v10  ;;  %v335_v26 = vpack.c.bf16 %v153_v25, %v152_v24  ;;  %v338_v29 = vpack.c.bf16 %v155_v28, %v154_v27  ;;  %v248_v30 = vld [vmem:[%s540_s3] ss:$0 sm:$0xff]  ;;  %v250_v35 = vld [vmem:[%s540_s3 + $0x1] ss:$0 sm:$0xff] }
  0x3e   :  { %321 = vmatpush3.bf16.msra.mxu1 %v320_v11  ;;  %p423_p0 = pnand %p422_p13, %p416_p10 }
  0x3f   :  { %322 = vmatprep.subr.bf16.mxu1 %v448_v0 }
  0x42   :  { %324 = vmatpush3.bf16.msra.mxu1 %v323_v14 }
  0x43   :  { %325 = vmatprep.subr.bf16.mxu1 %v448_v0 }
  0x46   :  { %327 = vmatpush3.bf16.msra.mxu1 %v326_v17 }
  0x47   :  { %328 = vmatprep.subr.bf16.mxu1 %v448_v0 }
  0x4a   :  { %330 = vmatpush3.bf16.msra.mxu1 %v329_v20 }
  0x4b   :  { %331 = vmatprep.subr.bf16.mxu1 %v448_v0 }
  0x4e   :  { %333 = vmatpush3.bf16.msra.mxu1 %v332_v23 }
  0x4f   :  { %334 = vmatprep.subr.bf16.mxu1 %v448_v0 }
  0x52   :  { %336 = vmatpush3.bf16.msra.mxu1 %v335_v26 }
  0x53   :  { %337 = vmatprep.subr.bf16.mxu1 %v448_v0 }
  0x56   :  { %339 = vmatpush3.bf16.msra.mxu1 %v338_v29 }
 0x110   :  { %v135_v31 = vpop.f32.mrb[0].mxu0 }
 0x111   :  { %v136_v32 = vadd.f32 %v248_v30, %v135_v31  ;;  %v277_v33 = vpop.f32.mrb[1].mxu0 }
 0x113   :  { %v139_v34 = vmax.f32 %v136_v32, 0.0 }
 0x115   :  { %311 = vmatmul.mubr.f32.vlgmr.msra.gmra.mrb[0].mxu1 %v139_v34 }
 0x1e8   :  { %v227_v36 = vpop.f32.mrb[0].mxu1 }
 0x1e9   :  { %v228_v37 = vadd.f32 %v250_v35, %v227_v36  ;;  %v312_v38 = vpop.f32.mrb[1].mxu1 }
 0x1eb   :  { %231 = vst [vmem:[#allocation8] sm:$0xff] %v228_v37 }
 0x1ec   :  { %426 = shalt.err (!%p423_p0)
}
 0x1ed   :  { %s427_s7 = scalar_lea.hbm %s541_s4, 128 }
 0x1ee   :  { %p428_p1 = scmp.ne.s32.totalorder %s541_s4, %s427_s7  ;;  %p431_p2 = scmp.lt.u32.totalorder %s427_s7, %s541_s4 }
 0x1f0   :  { %p433_p3 = pnand %p431_p2, %p428_p1 }
 0x1f2   :  { %436 = shalt.err (!%p433_p3)
}
 0x1f3   :  { %241 = dma.vmem_to_hbm [thread:$0]  %s239_s29, 128, %s541_s4, [#allocation4]  }
 0x1f4   :  { %441 = dma.done.wait [#allocation4], 128  }
 0x1f5   :  { %442 = vsyncadd [#allocation4], 4294967168 }
 0x1f6   :  { %245 = vsyncpa [#allocation3], 1 }
 0x1f7   :  { %246 = vsyncpa [#allocation6], 1 }
 0x1f8   :  { %247 = vsyncpa [#allocation4], 1 }

</bundles_post_ra>
